<compile_context>
chip_gen: v7x
topology: tpu7x:2x2x1
jax: 0.10.0
libtpu: 0.0.40
codegen_flags: <defaults>
</compile_context>

<pallas_src>
import functools

import jax
import jax.numpy as jnp
from jax.experimental import pallas as pl
from jax.experimental.pallas import tpu as pltpu


def _a2c_fused_kernel(x_ref, w1_ref, b1_ref, wh_ref, bh_ref,
                      logits_ref, value_ref):
    # Shared trunk: Linear(D, H) + ReLU.  bf16 operands, f32 MXU accumulate.
    h = jnp.dot(x_ref[...], w1_ref[...], preferred_element_type=jnp.float32)
    h = jnp.maximum(h + b1_ref[...], 0.0)

    # Fused actor+critic head: one (H, A+1) matmul, then split lanes into the
    # two narrow outputs (masked stores of A and 1 lanes are negligible vs.
    # writing a padded 128-lane f32 slab).
    y = jnp.dot(h.astype(wh_ref.dtype), wh_ref[...],
                preferred_element_type=jnp.float32)
    y = y + bh_ref[...]
    a = logits_ref.shape[-1]
    logits_ref[...] = y[:, :a].astype(logits_ref.dtype)
    value_ref[...] = y[:, a:a + 1].astype(value_ref.dtype)


def _pick_b_tile(batch):
    """Largest multiple-of-8 row tile <= 512; forces >=2 grid steps for big
    batches so v7x megacore has work to shard (harmless on v5e/v6e)."""
    rows = max(8, pl.cdiv(batch, 8) * 8)
    if rows <= 512:
        return rows
    return min(512, pl.cdiv(pl.cdiv(rows, 2), 8) * 8)


@functools.partial(jax.jit, static_argnames=("b_tile",))
def a2c_forward(x, w1, b1, wh, bh, *, b_tile=None):
    """Returns (logits [B, A], value [B, 1]) matching the PyTorch module.

    Takes packed params from `pack_params` (W1/Wh in bf16, biases in f32)."""
    B, D = x.shape
    H = w1.shape[1]
    n_out = wh.shape[1]
    A = n_out - 1

    if b_tile is None:
        b_tile = _pick_b_tile(B)
    else:
        b_tile = max(8, pl.cdiv(b_tile, 8) * 8)   # honor the (8,128) constraint
    grid = (pl.cdiv(B, b_tile),)                  # ragged tail handled by Pallas

    x = x.astype(w1.dtype)   # bf16 for the MXU; halves x HBM/VMEM traffic

    logits, value = pl.pallas_call(
        _a2c_fused_kernel,
        out_shape=(jax.ShapeDtypeStruct((B, A), jnp.float32),
                   jax.ShapeDtypeStruct((B, 1), jnp.float32)),
        grid=grid,
        in_specs=[
            pl.BlockSpec((b_tile, D), lambda i: (i, 0)),   # x: tiled on batch
            pl.BlockSpec((D, H), lambda i: (0, 0)),        # W1: VMEM resident
            pl.BlockSpec((1, H), lambda i: (0, 0)),        # b1
            pl.BlockSpec((H, n_out), lambda i: (0, 0)),    # packed head weight
            pl.BlockSpec((1, n_out), lambda i: (0, 0)),    # packed head bias
        ],
        out_specs=[
            pl.BlockSpec((b_tile, A), lambda i: (i, 0)),   # logits
            pl.BlockSpec((b_tile, 1), lambda i: (i, 0)),   # value
        ],
        compiler_params=pltpu.CompilerParams(
            dimension_semantics=("parallel",)),   # v7x: shard batch over 2 TCs
    )(x, w1, b1, wh, bh)
    return logits, value


def pack_params(w1, b1, wa, ba, wc, bc, *, compute_dtype=jnp.bfloat16):
    """One-time parameter packing (do NOT call per forward step): fuse the
    actor/critic heads into one matrix and cast matmul operands to bf16.
    Biases stay f32; the kernel accumulates in f32."""
    wh = jnp.concatenate([wa, wc], axis=1)          # (H, A+1)
    bh = jnp.concatenate([ba, bc], axis=1)          # (1, A+1)
    return (w1.astype(compute_dtype), b1.astype(jnp.float32),
            wh.astype(compute_dtype), bh.astype(jnp.float32))


def init_params(key, dim_in, hidden_size, num_actions):
    """PyTorch-Linear-style init (uniform +/- 1/sqrt(fan_in)); f32 'master'
    weights stored as [in, out] so the kernel computes y = x @ W + b."""
    ks = jax.random.split(key, 6)

    def lin(kw, kb, fan_in, fan_out):
        bound = 1.0 / jnp.sqrt(fan_in)
        w = jax.random.uniform(kw, (fan_in, fan_out), jnp.float32, -bound, bound)
        b = jax.random.uniform(kb, (1, fan_out), jnp.float32, -bound, bound)
        return w, b

    w1, b1 = lin(ks[0], ks[1], dim_in, hidden_size)
    wa, ba = lin(ks[2], ks[3], hidden_size, num_actions)
    wc, bc = lin(ks[4], ks[5], hidden_size, 1)
    return w1, b1, wa, ba, wc, bc


if __name__ == "__main__":
    key = jax.random.PRNGKey(0)
    kx, kp = jax.random.split(key)

    batch, dim_in, hidden_size, num_actions = 8, 16, 32, 4

    x = jax.random.normal(kx, (batch, dim_in), jnp.float32)
    raw = init_params(kp, dim_in, hidden_size, num_actions)
    packed = pack_params(*raw)       # once, outside the forward/training loop

    logits, value = a2c_forward(x, *packed)
    jax.block_until_ready((logits, value))

    # Reference in plain f32 JAX.  The kernel uses bf16 matmul operands with
    # f32 accumulation, so tolerances are loosened accordingly.
    w1, b1, wa, ba, wc, bc = raw
    h_ref = jnp.maximum(x @ w1 + b1, 0.0)
    logits_ref = h_ref @ wa + ba
    value_ref = h_ref @ wc + bc
    assert logits.shape == (batch, num_actions)
    assert value.shape == (batch, 1)
    assert jnp.allclose(logits, logits_ref, atol=5e-2, rtol=5e-2)
    assert jnp.allclose(value, value_ref, atol=5e-2, rtol=5e-2)

    print("KERNEL_OK")
</pallas_src>

<mosaic_0001>
module attributes {stable_mosaic.version = 11 : i64} {
  func.func @_a2c_fused_kernel(%arg0: i32, %arg1: memref<8x16xbf16, #tpu.memory_space<vmem>>, %arg2: memref<16x32xbf16, #tpu.memory_space<vmem>>, %arg3: memref<1x32xf32, #tpu.memory_space<vmem>>, %arg4: memref<32x5xbf16, #tpu.memory_space<vmem>>, %arg5: memref<1x5xf32, #tpu.memory_space<vmem>>, %arg6: memref<8x4xf32, #tpu.memory_space<vmem>>, %arg7: memref<8x1xf32, #tpu.memory_space<vmem>>) attributes {dimension_semantics = [#tpu.dimension_semantics<parallel>], iteration_bounds = array<i64: 1>, scalar_prefetch = 0 : i64, scratch_operands = 0 : i64, tpu.core_type = #tpu.core_type<tc>, window_params = [{transform_indices = @transform_0, window_bounds = array<i64: 8, 16>}, {pipeline_mode = #tpu.pipeline_mode<synchronous>, transform_indices = @transform_1, window_bounds = array<i64: 16, 32>}, {pipeline_mode = #tpu.pipeline_mode<synchronous>, transform_indices = @transform_2, window_bounds = array<i64: 1, 32>}, {pipeline_mode = #tpu.pipeline_mode<synchronous>, transform_indices = @transform_3, window_bounds = array<i64: 32, 5>}, {pipeline_mode = #tpu.pipeline_mode<synchronous>, transform_indices = @transform_4, window_bounds = array<i64: 1, 5>}, {transform_indices = @transform_5, window_bounds = array<i64: 8, 4>}, {transform_indices = @transform_6, window_bounds = array<i64: 8, 1>}]} {
    %c0 = arith.constant 0 : index
    %c0_0 = arith.constant 0 : index
    %0 = vector.load %arg1[%c0, %c0_0] : memref<8x16xbf16, #tpu.memory_space<vmem>>, vector<8x16xbf16>
    %c0_1 = arith.constant 0 : index
    %c0_2 = arith.constant 0 : index
    %1 = vector.load %arg2[%c0_1, %c0_2] : memref<16x32xbf16, #tpu.memory_space<vmem>>, vector<16x32xbf16>
    %cst = arith.constant dense<0.000000e+00> : vector<8x32xf32>
    %2 = tpu.matmul %0, %1, %cst {dimension_numbers = #tpu.dot_dimension_numbers<[1], [0], [0], [1], [0, 0, 1, 1], [], []>} : vector<8x16xbf16>, vector<16x32xbf16>, vector<8x32xf32> -> vector<8x32xf32>
    %c0_3 = arith.constant 0 : index
    %c0_4 = arith.constant 0 : index
    %3 = vector.load %arg3[%c0_3, %c0_4] : memref<1x32xf32, #tpu.memory_space<vmem>>, vector<1x32xf32>
    %4 = vector.broadcast %3 : vector<1x32xf32> to vector<8x32xf32>
    %5 = arith.addf %2, %4 : vector<8x32xf32>
    %cst_5 = arith.constant 0.000000e+00 : f32
    %6 = vector.broadcast %cst_5 : f32 to vector<8x32xf32>
    %7 = arith.maximumf %5, %6 : vector<8x32xf32>
    %8 = arith.truncf %7 : vector<8x32xf32> to vector<8x32xbf16>
    %c0_6 = arith.constant 0 : index
    %c0_7 = arith.constant 0 : index
    %9 = vector.load %arg4[%c0_6, %c0_7] : memref<32x5xbf16, #tpu.memory_space<vmem>>, vector<32x5xbf16>
    %cst_8 = arith.constant dense<0.000000e+00> : vector<8x5xf32>
    %10 = tpu.matmul %8, %9, %cst_8 {dimension_numbers = #tpu.dot_dimension_numbers<[1], [0], [0], [1], [0, 0, 1, 1], [], []>} : vector<8x32xbf16>, vector<32x5xbf16>, vector<8x5xf32> -> vector<8x5xf32>
    %c0_9 = arith.constant 0 : index
    %c0_10 = arith.constant 0 : index
    %11 = vector.load %arg5[%c0_9, %c0_10] : memref<1x5xf32, #tpu.memory_space<vmem>>, vector<1x5xf32>
    %12 = vector.broadcast %11 : vector<1x5xf32> to vector<8x5xf32>
    %13 = arith.addf %10, %12 : vector<8x5xf32>
    %14 = vector.extract_strided_slice %13 {offsets = [0, 0], sizes = [8, 4], strides = [1, 1]} : vector<8x5xf32> to vector<8x4xf32>
    %c0_11 = arith.constant 0 : index
    %c0_12 = arith.constant 0 : index
    %15 = vector.load %arg6[%c0_11, %c0_12] : memref<8x4xf32, #tpu.memory_space<vmem>>, vector<8x4xf32>
    tpu.vector_store %arg6[%c0_11, %c0_12], %14 {strides = array<i32>} : memref<8x4xf32, #tpu.memory_space<vmem>>, vector<8x4xf32>,
    %16 = vector.extract_strided_slice %13 {offsets = [0, 4], sizes = [8, 1], strides = [1, 1]} : vector<8x5xf32> to vector<8x1xf32>
    %c0_13 = arith.constant 0 : index
    %c0_14 = arith.constant 0 : index
    %17 = vector.load %arg7[%c0_13, %c0_14] : memref<8x1xf32, #tpu.memory_space<vmem>>, vector<8x1xf32>
    tpu.vector_store %arg7[%c0_13, %c0_14], %16 {strides = array<i32>} : memref<8x1xf32, #tpu.memory_space<vmem>>, vector<8x1xf32>,
    return
  }
  func.func @transform_0(%arg0: i32) -> (i32, i32) {
    %c0_i32 = arith.constant 0 : i32
    %c0_i32_0 = arith.constant 0 : i32
    return %arg0, %c0_i32 : i32, i32
  }
  func.func @transform_1(%arg0: i32) -> (i32, i32) {
    %c0_i32 = arith.constant 0 : i32
    %c0_i32_0 = arith.constant 0 : i32
    %c0_i32_1 = arith.constant 0 : i32
    return %c0_i32, %c0_i32_0 : i32, i32
  }
  func.func @transform_2(%arg0: i32) -> (i32, i32) {
    %c0_i32 = arith.constant 0 : i32
    %c0_i32_0 = arith.constant 0 : i32
    %c0_i32_1 = arith.constant 0 : i32
    return %c0_i32, %c0_i32_0 : i32, i32
  }
  func.func @transform_3(%arg0: i32) -> (i32, i32) {
    %c0_i32 = arith.constant 0 : i32
    %c0_i32_0 = arith.constant 0 : i32
    %c0_i32_1 = arith.constant 0 : i32
    return %c0_i32, %c0_i32_0 : i32, i32
  }
  func.func @transform_4(%arg0: i32) -> (i32, i32) {
    %c0_i32 = arith.constant 0 : i32
    %c0_i32_0 = arith.constant 0 : i32
    %c0_i32_1 = arith.constant 0 : i32
    return %c0_i32, %c0_i32_0 : i32, i32
  }
  func.func @transform_5(%arg0: i32) -> (i32, i32) {
    %c0_i32 = arith.constant 0 : i32
    %c0_i32_0 = arith.constant 0 : i32
    return %arg0, %c0_i32 : i32, i32
  }
  func.func @transform_6(%arg0: i32) -> (i32, i32) {
    %c0_i32 = arith.constant 0 : i32
    %c0_i32_0 = arith.constant 0 : i32
    return %arg0, %c0_i32 : i32, i32
  }
}

</mosaic_0001>

<bundles_post_ra>
// kernel: a2c_forward.1
= control target key start
LH: loop header
LB: loop body
LE: loop exit
PB: predicated region body
PF: predicated region fallthrough
CT: control target
= control target key end

     0   :  { %v200_v0 = vmov 0.0   ;;  %vm201_vm0 = vmmov 0   ;;  %vm39_vm1 = vcmask 130048   ;;  %vm108_vm2 = vcmask 261120   ;;  %s202_s7 = smov 124   ;;  %s262_s1 = inlined_call_operand.vmem [shape: bf16[16,32], index: 1, kind: input, shape index: {}]   ;;  %s263_s0 = inlined_call_operand.vmem [shape: bf16[8,16], index: 0, kind: input, shape index: {}]   ;;  %s264_s3 = inlined_call_operand.vmem [shape: bf16[32,5], index: 3, kind: input, shape index: {}]   ;;  %s265_s2 = inlined_call_operand.vmem [shape: f32[1,32], index: 2, kind: input, shape index: {}]   ;;  %s266_s4 = inlined_call_operand.vmem [shape: f32[1,5], index: 4, kind: input, shape index: {}]   ;;  %s267_s5 = inlined_call_operand.vmem [shape: f32[8,4], index: 5, kind: output, shape index: {0}]   ;;  %s268_s6 = inlined_call_operand.vmem [shape: f32[8,1], index: 6, kind: output, shape index: {1}]  }
   0x1   :  { %180 = vmatprep.subr.bf16.mxu0 %v200_v0  ;;  %v197_v1 = vld [vmem:[%s262_s1] sm:$0xff]   ;;  %182 = vmatprep.mubr.msk.bf16.mxu0 %vm201_vm0, %v200_v0  ;;  %v199_v4 = vld [vmem:[%s264_s3 + $0x8] sm:$0xff]   ;;  %vm152_vm3 = vcmask 31744   ;;  %vm158_vm4 = vcmask 7168  }
   0x2   :  { %186 = vmatprep.subr.bf16.mxu1 %v200_v0  ;;  %190 = vmatprep.mubr.msk.bf16.mxu1 %vm201_vm0, %v200_v0  ;;  %v23_v2 = vld [vmem:[%s263_s0] sm:$0xf] }
   0x3   :  { %181 = vmatpush3.bf16.msra.mxu0 %v197_v1  ;;  %v198_v3 = vld [vmem:[%s264_s3] sm:$0xff]  }
   0x4   :  { %187 = vmatpush3.bf16.msra.mxu1 %v198_v3  ;;  %v168_v5 = vld [vmem:[%s265_s2] ss:$0 sm:$0xff] }
   0x5   :  { %188 = vmatprep.subr.bf16.mxu1 %v200_v0  ;;  %v171_v13 = vld [vmem:[%s266_s4] ss:$0 sm:$0xff] }
   0x6   :  { %183 = vmatmul.mubr.msk.bf16.vlgmr.msra.gmra.mrb[0].mxu0 %vm39_vm1, %v23_v2 }
   0x8   :  { %189 = vmatpush3.bf16.msra.mxu1 %v199_v4 }
  0xd9   :  { %v77_v6 = vpop.f32.mrb[0].mxu0 }
  0xda   :  { %v78_v7 = vadd.f32 %v168_v5, %v77_v6  ;;  %v184_v8 = vpop.f32.mrb[1].mxu0 }
  0xdb   :  { %v80_v9 = vpop.f32.mrb[2].mxu0 }
  0xdc   :  { %v83_v10 = vmax.f32 %v78_v7, 0.0  ;;  %v185_v11 = vpop.f32.mrb[3].mxu0 }
  0xde   :  { %v84_v12 = vpack.c.bf16 %v83_v10, %v83_v10 }
  0xe0   :  { %191 = vmatmul.mubr.msk.bf16.vlgmr.msra.gmra.mrb[0].mxu1 %vm108_vm2, %v84_v12 }
 0x1b3   :  { %v146_v14 = vpop.f32.mrb[0].mxu1 }
 0x1b4   :  { %v147_v15 = vadd.f32 %v171_v13, %v146_v14  ;;  %v192_v16 = vpop.f32.mrb[1].mxu1 }
 0x1b5   :  { %v149_v17 = vpop.f32.mrb[2].mxu1 }
 0x1b6   :  { %153 = vst.msk [vmem:[%s267_s5] sm:$0xff] %vm152_vm3, %v147_v15  ;;  %v193_v18 = vpop.f32.mrb[3].mxu1  ;;  %155 = vrot.lane.b32.xlu0 %v147_v15, %s202_s7 }
 0x228   :  { %v156_v19 = vpop.permute.xlu0 %155 }
 0x229   :  { %159 = vst.msk [vmem:[%s268_s6] sm:$0xff] %vm158_vm4, %v156_v19 }

</bundles_post_ra>
